<compile_context>
chip_gen: v7x
topology: tpu7x:2x2x1
jax: 0.10.0
libtpu: 0.0.40
codegen_flags: <defaults>
</compile_context>

<pallas_src>
import functools

import jax
import jax.numpy as jnp
from jax import lax
from jax.experimental import pallas as pl
from jax.experimental.pallas import tpu as pltpu


def _round_up(x, m):
    return (x + m - 1) // m * m


def image_encoder_kernel(x_ref, wb_ref, w1_ref, w2_ref, gamma_ref, beta_ref,
                         out_ref, acc_ref, *, dim_out):
    k = pl.program_id(1)

    @pl.when(k == 0)
    def _():
        acc_ref[...] = jnp.zeros_like(acc_ref)

    # --- frozen backbone ---
    # TODO(synk): the real CLIP vision transformer is an external frozen module;
    # it is represented here by a single deterministic linear projection to dim_in.
    # K-tiled bf16 matmul, f32 accumulation in VMEM scratch.
    acc_ref[...] += jnp.dot(x_ref[...], wb_ref[...],
                            preferred_element_type=jnp.float32)

    @pl.when(k == pl.num_programs(1) - 1)
    def _():
        feats = acc_ref[...]                                      # [tm, Din_p] f32

        # --- ProjectionHead (bf16 MXU operands, f32 accumulation) ---
        embed1 = jnp.dot(feats.astype(jnp.bfloat16), w1_ref[...],
                         preferred_element_type=jnp.float32)      # [tm, Dout_p]

        # exact (erf-based) GELU, matching torch.nn.functional.gelu default
        inv_sqrt2 = jnp.float32(0.7071067811865476)
        g = 0.5 * embed1 * (1.0 + lax.erf(embed1 * inv_sqrt2))

        embed2 = jnp.dot(g.astype(jnp.bfloat16), w2_ref[...],
                         preferred_element_type=jnp.float32)      # [tm, Dout_p]
        # nn.Dropout is identity at inference time.

        # Pad columns of embed1/embed2 are exactly zero (zero-padded weights).
        h = embed1 + embed2

        # LayerNorm over the TRUE dim_out, eps=1e-5, fused single-pass stats
        # (biased variance via E[x^2] - E[x]^2; pad columns contribute 0).
        inv_n = jnp.float32(1.0 / dim_out)
        mean = jnp.sum(h, axis=-1, keepdims=True) * inv_n
        ex2 = jnp.sum(h * h, axis=-1, keepdims=True) * inv_n
        var = ex2 - mean * mean
        normed = (h - mean) * lax.rsqrt(var + jnp.float32(1e-5))
        # gamma/beta are zero on pad columns -> embeds pad columns are zero.
        embeds = normed * gamma_ref[...] + beta_ref[...]

        # L2 normalization via rsqrt-multiply (no vector divide).
        l2sq = jnp.sum(embeds * embeds, axis=-1, keepdims=True)
        out_ref[...] = (embeds * lax.rsqrt(l2sq)).astype(out_ref.dtype)


def image_encoder(x_nchw, wb, w1, w2, gamma, beta, *, tile_m=128, tile_k=512):
    """x_nchw: [B, C, H, W].  wb: [F, dim_in], w1: [dim_in, dim_out],
    w2: [dim_out, dim_out], gamma/beta: [dim_out].
    Returns [B, dim_out] float32 with unit L2 rows."""
    B, C, H, W = x_nchw.shape
    F = C * H * W
    dim_in = wb.shape[1]
    dim_out = w1.shape[1]

    # ---- tile / pad geometry ----
    tm = min(tile_m, _round_up(B, 8))            # batch tile (sublane-aligned)
    B_pad = _round_up(B, tm)
    tk = min(tile_k, _round_up(F, 128))          # backbone reduction tile
    F_pad = _round_up(F, tk)
    Din_p = _round_up(dim_in, 128)               # MXU / lane dense
    Dout_p = _round_up(dim_out, 128)             # lane-dense output

    # ---- flatten + zero-pad inputs / weights (pads are exactly zero) ----
    x_flat = x_nchw.reshape(B, F).astype(jnp.bfloat16)
    x_p = jnp.zeros((B_pad, F_pad), jnp.bfloat16).at[:B, :F].set(x_flat)
    wb_p = jnp.zeros((F_pad, Din_p), jnp.bfloat16).at[:F, :dim_in].set(
        wb.astype(jnp.bfloat16))
    w1_p = jnp.zeros((Din_p, Dout_p), jnp.bfloat16).at[:dim_in, :dim_out].set(
        w1.astype(jnp.bfloat16))
    w2_p = jnp.zeros((Dout_p, Dout_p), jnp.bfloat16).at[:dim_out, :dim_out].set(
        w2.astype(jnp.bfloat16))
    gamma_p = jnp.zeros((1, Dout_p), jnp.float32).at[0, :dim_out].set(
        gamma.reshape(dim_out).astype(jnp.float32))
    beta_p = jnp.zeros((1, Dout_p), jnp.float32).at[0, :dim_out].set(
        beta.reshape(dim_out).astype(jnp.float32))

    grid = (B_pad // tm, F_pad // tk)

    # ---- VMEM budget (double-buffered pipelined operands + resident weights) ----
    vmem_needed = (
        2 * (tm * tk * 2 + tk * Din_p * 2)            # x / wb tiles, bf16, 2-deep
        + Din_p * Dout_p * 2 + Dout_p * Dout_p * 2    # w1, w2 (resident, bf16)
        + 2 * Dout_p * 4                              # gamma, beta
        + 2 * tm * Dout_p * 4                         # output block (double-buffered)
        + tm * Din_p * 4                              # f32 accumulator scratch
    )
    vmem_limit = int(min(max(2 * vmem_needed, 32 * 1024 * 1024), 64 * 1024 * 1024))

    cost = pl.CostEstimate(
        flops=2 * B * (F * dim_in + dim_in * dim_out + dim_out * dim_out),
        transcendentals=B * dim_out,                  # erf in GELU
        bytes_accessed=(x_p.size * 2 + wb_p.size * 2 + w1_p.size * 2
                        + w2_p.size * 2 + gamma_p.size * 4 + beta_p.size * 4
                        + B_pad * Dout_p * 4),
    )

    kernel = functools.partial(image_encoder_kernel, dim_out=dim_out)

    out_p = pl.pallas_call(
        kernel,
        out_shape=jax.ShapeDtypeStruct((B_pad, Dout_p), jnp.float32),
        grid_spec=pltpu.PrefetchScalarGridSpec(
            num_scalar_prefetch=0,
            grid=grid,
            in_specs=[
                pl.BlockSpec((tm, tk), lambda i, k: (i, k)),          # x tile
                pl.BlockSpec((tk, Din_p), lambda i, k: (k, 0)),       # wb tile
                pl.BlockSpec((Din_p, Dout_p), lambda i, k: (0, 0)),   # w1 (resident)
                pl.BlockSpec((Dout_p, Dout_p), lambda i, k: (0, 0)),  # w2 (resident)
                pl.BlockSpec((1, Dout_p), lambda i, k: (0, 0)),       # gamma
                pl.BlockSpec((1, Dout_p), lambda i, k: (0, 0)),       # beta
            ],
            out_specs=pl.BlockSpec((tm, Dout_p), lambda i, k: (i, 0)),
            scratch_shapes=[pltpu.VMEM((tm, Din_p), jnp.float32)],
        ),
        compiler_params=pltpu.CompilerParams(
            dimension_semantics=("parallel", "arbitrary"),
            vmem_limit_bytes=vmem_limit,
        ),
        cost_estimate=cost,
    )(x_p, wb_p, w1_p, w2_p, gamma_p, beta_p)

    return out_p[:B, :dim_out]


if __name__ == "__main__":
    # Small, deterministic shapes consistent with the module.
    B, C, H, W = 2, 4, 16, 16          # input images, NCHW
    dim_in, dim_out = 64, 32           # backbone feature dim -> projection dim
    feat = C * H * W                   # flattened image features (1024)

    key = jax.random.PRNGKey(0)
    kx, kb, k1, k2 = jax.random.split(key, 4)

    x = jax.random.normal(kx, (B, C, H, W), dtype=jnp.float32)

    # Deterministic synthetic parameters (no checkpoint loading).
    # Backbone stand-in weight, stored already-transposed: [feat, dim_in]
    wb = jax.random.normal(kb, (feat, dim_in), dtype=jnp.float32) * 0.02
    # Linear weights stored transposed relative to torch (y = x @ W.T -> pass W.T):
    w1 = jax.random.normal(k1, (dim_in, dim_out), dtype=jnp.float32) * 0.05   # linear1
    w2 = jax.random.normal(k2, (dim_out, dim_out), dtype=jnp.float32) * 0.05  # linear2
    gamma = jnp.ones((dim_out,), dtype=jnp.float32)   # LayerNorm weight
    beta = jnp.zeros((dim_out,), dtype=jnp.float32)   # LayerNorm bias

    out = image_encoder(x, wb, w1, w2, gamma, beta)
    out = jax.block_until_ready(out)

    assert out.shape == (B, dim_out)
    # Sanity: rows should be unit-norm and finite.
    norms = jnp.sqrt(jnp.sum(out * out, axis=-1))
    assert bool(jnp.all(jnp.isfinite(out)))
    assert bool(jnp.all(jnp.abs(norms - 1.0) < 1e-3))

    print("KERNEL_OK")
</pallas_src>

<mosaic_0001>
module attributes {stable_mosaic.version = 11 : i64} {
  func.func @image_encoder_kernel(%arg0: i32, %arg1: i32, %arg2: memref<8x512xbf16, #tpu.memory_space<vmem>>, %arg3: memref<512x128xbf16, #tpu.memory_space<vmem>>, %arg4: memref<128x128xbf16, #tpu.memory_space<vmem>>, %arg5: memref<128x128xbf16, #tpu.memory_space<vmem>>, %arg6: memref<1x128xf32, #tpu.memory_space<vmem>>, %arg7: memref<1x128xf32, #tpu.memory_space<vmem>>, %arg8: memref<8x128xf32, #tpu.memory_space<vmem>>, %arg9: memref<8x128xf32, #tpu.memory_space<vmem>>) attributes {dimension_semantics = [#tpu.dimension_semantics<parallel>, #tpu.dimension_semantics<arbitrary>], iteration_bounds = array<i64: 1, 2>, scalar_prefetch = 0 : i64, scratch_operands = 1 : i64, tpu.core_type = #tpu.core_type<tc>, window_params = [{transform_indices = @transform_0, window_bounds = array<i64: 8, 512>}, {transform_indices = @transform_1, window_bounds = array<i64: 512, 128>}, {pipeline_mode = #tpu.pipeline_mode<synchronous>, transform_indices = @transform_2, window_bounds = array<i64: 128, 128>}, {pipeline_mode = #tpu.pipeline_mode<synchronous>, transform_indices = @transform_3, window_bounds = array<i64: 128, 128>}, {pipeline_mode = #tpu.pipeline_mode<synchronous>, transform_indices = @transform_4, window_bounds = array<i64: 1, 128>}, {pipeline_mode = #tpu.pipeline_mode<synchronous>, transform_indices = @transform_5, window_bounds = array<i64: 1, 128>}, {transform_indices = @transform_6, window_bounds = array<i64: 8, 128>}]} {
    %c0_i32 = arith.constant 0 : i32
    %0 = arith.cmpi eq, %arg1, %c0_i32 : i32
    %1 = arith.extui %0 : i1 to i32
    %c0_i32_0 = arith.constant 0 : i32
    %2 = arith.cmpi ne, %1, %c0_i32_0 : i32
    scf.if %2 {
      %cst_9 = arith.constant 0.000000e+00 : f32
      %12 = vector.broadcast %cst_9 : f32 to vector<8x128xf32>
      %c0_10 = arith.constant 0 : index
      %c0_11 = arith.constant 0 : index
      %13 = vector.load %arg9[%c0_10, %c0_11] : memref<8x128xf32, #tpu.memory_space<vmem>>, vector<8x128xf32>
      tpu.vector_store %arg9[%c0_10, %c0_11], %12 {strides = array<i32>} : memref<8x128xf32, #tpu.memory_space<vmem>>, vector<8x128xf32>,
    } else {
    }
    %c0 = arith.constant 0 : index
    %c0_1 = arith.constant 0 : index
    %3 = vector.load %arg9[%c0, %c0_1] : memref<8x128xf32, #tpu.memory_space<vmem>>, vector<8x128xf32>
    %c0_2 = arith.constant 0 : index
    %c0_3 = arith.constant 0 : index
    %4 = vector.load %arg2[%c0_2, %c0_3] : memref<8x512xbf16, #tpu.memory_space<vmem>>, vector<8x512xbf16>
    %c0_4 = arith.constant 0 : index
    %c0_5 = arith.constant 0 : index
    %5 = vector.load %arg3[%c0_4, %c0_5] : memref<512x128xbf16, #tpu.memory_space<vmem>>, vector<512x128xbf16>
    %cst = arith.constant dense<0.000000e+00> : vector<8x128xf32>
    %6 = tpu.matmul %4, %5, %cst {dimension_numbers = #tpu.dot_dimension_numbers<[1], [0], [0], [1], [0, 0, 1, 1], [], []>} : vector<8x512xbf16>, vector<512x128xbf16>, vector<8x128xf32> -> vector<8x128xf32>
    %7 = arith.addf %3, %6 : vector<8x128xf32>
    %c0_6 = arith.constant 0 : index
    %c0_7 = arith.constant 0 : index
    %8 = vector.load %arg9[%c0_6, %c0_7] : memref<8x128xf32, #tpu.memory_space<vmem>>, vector<8x128xf32>
    tpu.vector_store %arg9[%c0_6, %c0_7], %7 {strides = array<i32>} : memref<8x128xf32, #tpu.memory_space<vmem>>, vector<8x128xf32>,
    %c1_i32 = arith.constant 1 : i32
    %9 = arith.cmpi eq, %arg1, %c1_i32 : i32
    %10 = arith.extui %9 : i1 to i32
    %c0_i32_8 = arith.constant 0 : i32
    %11 = arith.cmpi ne, %10, %c0_i32_8 : i32
    scf.if %11 {
      %c0_9 = arith.constant 0 : index
      %c0_10 = arith.constant 0 : index
      %12 = vector.load %arg9[%c0_9, %c0_10] : memref<8x128xf32, #tpu.memory_space<vmem>>, vector<8x128xf32>
      %13 = arith.truncf %12 : vector<8x128xf32> to vector<8x128xbf16>
      %c0_11 = arith.constant 0 : index
      %c0_12 = arith.constant 0 : index
      %14 = vector.load %arg4[%c0_11, %c0_12] : memref<128x128xbf16, #tpu.memory_space<vmem>>, vector<128x128xbf16>
      %cst_13 = arith.constant dense<0.000000e+00> : vector<8x128xf32>
      %15 = tpu.matmul %13, %14, %cst_13 {dimension_numbers = #tpu.dot_dimension_numbers<[1], [0], [0], [1], [0, 0, 1, 1], [], []>} : vector<8x128xbf16>, vector<128x128xbf16>, vector<8x128xf32> -> vector<8x128xf32>
      %cst_14 = arith.constant 5.000000e-01 : f32
      %16 = vector.broadcast %cst_14 : f32 to vector<8x128xf32>
      %17 = arith.mulf %16, %15 : vector<8x128xf32>
      %cst_15 = arith.constant 0.707106769 : f32
      %18 = vector.broadcast %cst_15 : f32 to vector<8x128xf32>
      %19 = arith.mulf %15, %18 : vector<8x128xf32>
      %20 = math.erf %19 : vector<8x128xf32>
      %cst_16 = arith.constant 1.000000e+00 : f32
      %21 = vector.broadcast %cst_16 : f32 to vector<8x128xf32>
      %22 = arith.addf %21, %20 : vector<8x128xf32>
      %23 = arith.mulf %17, %22 : vector<8x128xf32>
      %24 = arith.truncf %23 : vector<8x128xf32> to vector<8x128xbf16>
      %c0_17 = arith.constant 0 : index
      %c0_18 = arith.constant 0 : index
      %25 = vector.load %arg5[%c0_17, %c0_18] : memref<128x128xbf16, #tpu.memory_space<vmem>>, vector<128x128xbf16>
      %cst_19 = arith.constant dense<0.000000e+00> : vector<8x128xf32>
      %26 = tpu.matmul %24, %25, %cst_19 {dimension_numbers = #tpu.dot_dimension_numbers<[1], [0], [0], [1], [0, 0, 1, 1], [], []>} : vector<8x128xbf16>, vector<128x128xbf16>, vector<8x128xf32> -> vector<8x128xf32>
      %27 = arith.addf %15, %26 : vector<8x128xf32>
      %cst_20 = arith.constant dense<0.000000e+00> : vector<8xf32>
      %28 = vector.multi_reduction <add>, %27, %cst_20 [1] : vector<8x128xf32> to vector<8xf32>
      %29 = vector.shape_cast %28 : vector<8xf32> to vector<8x1xf32>
      %cst_21 = arith.constant 3.125000e-02 : f32
      %30 = vector.broadcast %cst_21 : f32 to vector<8x1xf32>
      %31 = arith.mulf %29, %30 : vector<8x1xf32>
      %32 = arith.mulf %27, %27 : vector<8x128xf32>
      %cst_22 = arith.constant dense<0.000000e+00> : vector<8xf32>
      %33 = vector.multi_reduction <add>, %32, %cst_22 [1] : vector<8x128xf32> to vector<8xf32>
      %34 = vector.shape_cast %33 : vector<8xf32> to vector<8x1xf32>
      %cst_23 = arith.constant 3.125000e-02 : f32
      %35 = vector.broadcast %cst_23 : f32 to vector<8x1xf32>
      %36 = arith.mulf %34, %35 : vector<8x1xf32>
      %37 = arith.mulf %31, %31 : vector<8x1xf32>
      %38 = arith.subf %36, %37 : vector<8x1xf32>
      %39 = vector.broadcast %31 : vector<8x1xf32> to vector<8x128xf32>
      %40 = arith.subf %27, %39 : vector<8x128xf32>
      %cst_24 = arith.constant 9.99999974E-6 : f32
      %41 = vector.broadcast %cst_24 : f32 to vector<8x1xf32>
      %42 = arith.addf %38, %41 : vector<8x1xf32>
      %43 = math.rsqrt %42 : vector<8x1xf32>
      %44 = vector.broadcast %43 : vector<8x1xf32> to vector<8x128xf32>
      %45 = arith.mulf %40, %44 : vector<8x128xf32>
      %c0_25 = arith.constant 0 : index
      %c0_26 = arith.constant 0 : index
      %46 = vector.load %arg6[%c0_25, %c0_26] : memref<1x128xf32, #tpu.memory_space<vmem>>, vector<1x128xf32>
      %47 = vector.broadcast %46 : vector<1x128xf32> to vector<8x128xf32>
      %48 = arith.mulf %45, %47 : vector<8x128xf32>
      %c0_27 = arith.constant 0 : index
      %c0_28 = arith.constant 0 : index
      %49 = vector.load %arg7[%c0_27, %c0_28] : memref<1x128xf32, #tpu.memory_space<vmem>>, vector<1x128xf32>
      %50 = vector.broadcast %49 : vector<1x128xf32> to vector<8x128xf32>
      %51 = arith.addf %48, %50 : vector<8x128xf32>
      %52 = arith.mulf %51, %51 : vector<8x128xf32>
      %cst_29 = arith.constant dense<0.000000e+00> : vector<8xf32>
      %53 = vector.multi_reduction <add>, %52, %cst_29 [1] : vector<8x128xf32> to vector<8xf32>
      %54 = vector.shape_cast %53 : vector<8xf32> to vector<8x1xf32>
      %55 = math.rsqrt %54 : vector<8x1xf32>
      %56 = vector.broadcast %55 : vector<8x1xf32> to vector<8x128xf32>
      %57 = arith.mulf %51, %56 : vector<8x128xf32>
      %c0_30 = arith.constant 0 : index
      %c0_31 = arith.constant 0 : index
      %58 = vector.load %arg8[%c0_30, %c0_31] : memref<8x128xf32, #tpu.memory_space<vmem>>, vector<8x128xf32>
      tpu.vector_store %arg8[%c0_30, %c0_31], %57 {strides = array<i32>} : memref<8x128xf32, #tpu.memory_space<vmem>>, vector<8x128xf32>,
    } else {
    }
    return
  }
  func.func @transform_0(%arg0: i32, %arg1: i32) -> (i32, i32) {
    %c0_i32 = arith.constant 0 : i32
    return %arg0, %arg1 : i32, i32
  }
  func.func @transform_1(%arg0: i32, %arg1: i32) -> (i32, i32) {
    %c0_i32 = arith.constant 0 : i32
    %c0_i32_0 = arith.constant 0 : i32
    return %arg1, %c0_i32 : i32, i32
  }
  func.func @transform_2(%arg0: i32, %arg1: i32) -> (i32, i32) {
    %c0_i32 = arith.constant 0 : i32
    %c0_i32_0 = arith.constant 0 : i32
    %c0_i32_1 = arith.constant 0 : i32
    return %c0_i32, %c0_i32_0 : i32, i32
  }
  func.func @transform_3(%arg0: i32, %arg1: i32) -> (i32, i32) {
    %c0_i32 = arith.constant 0 : i32
    %c0_i32_0 = arith.constant 0 : i32
    %c0_i32_1 = arith.constant 0 : i32
    return %c0_i32, %c0_i32_0 : i32, i32
  }
  func.func @transform_4(%arg0: i32, %arg1: i32) -> (i32, i32) {
    %c0_i32 = arith.constant 0 : i32
    %c0_i32_0 = arith.constant 0 : i32
    %c0_i32_1 = arith.constant 0 : i32
    return %c0_i32, %c0_i32_0 : i32, i32
  }
  func.func @transform_5(%arg0: i32, %arg1: i32) -> (i32, i32) {
    %c0_i32 = arith.constant 0 : i32
    %c0_i32_0 = arith.constant 0 : i32
    %c0_i32_1 = arith.constant 0 : i32
    return %c0_i32, %c0_i32_0 : i32, i32
  }
  func.func @transform_6(%arg0: i32, %arg1: i32) -> (i32, i32) {
    %c0_i32 = arith.constant 0 : i32
    %c0_i32_0 = arith.constant 0 : i32
    return %arg0, %c0_i32 : i32, i32
  }
}

</mosaic_0001>

<bundles_post_ra>
// kernel: tpu_custom_call.1
= control target key start
LH: loop header
LB: loop body
LE: loop exit
PB: predicated region body
PF: predicated region fallthrough
CT: control target
= control target key end

     0   :  { %s1981_s0 = inlined_call_operand.hbm [shape: bf16[8,1024], index: 0, kind: input, shape index: {}]   ;;  %s1982_s1 = inlined_call_operand.hbm [shape: bf16[1024,128], index: 1, kind: input, shape index: {}]   ;;  %s1983_s2 = inlined_call_operand.hbm [shape: bf16[128,128], index: 2, kind: input, shape index: {}]   ;;  %s1984_s3 = inlined_call_operand.hbm [shape: bf16[128,128], index: 3, kind: input, shape index: {}]   ;;  %s1985_s4 = inlined_call_operand.vmem [shape: f32[1,128], index: 4, kind: input, shape index: {}]   ;;  %s1986_s5 = inlined_call_operand.vmem [shape: f32[1,128], index: 5, kind: input, shape index: {}]   ;;  %s1987_s6 = inlined_call_operand.hbm [shape: f32[8,128], index: 6, kind: output, shape index: {}]  }
   0x1   :  { %1993 = sst [smem:[#allocation17_spill]] %s1981_s0 }
   0x2   :  { %11 = vsyncpa [#allocation4], 0 }
   0x3   :  { %13 = vsyncpa [#allocation4 + $0x1], 0 }
   0x4   :  { %14 = vsyncpa [#allocation7], 0 }
   0x5   :  { %16 = vsyncpa [#allocation7 + $0x1], 0 }
   0x6   :  { %17 = vsyncpa [#allocation10], 0 }
   0x7   :  { %18 = vsyncpa [#allocation5], 0  ;;  %s1666_s21 = smov 0   ;;  %s1668_s22 = smov 0  }
   0x8   :  { %s1670_s23 = smov 0   ;;  %s1672_s24 = smov 0  }
   0x9   :  { %s1674_s25 = smov 0   ;;  %s1676_s26 = smov 0  }
   0xa LB: > { %s1695_s27 = sadd.s32 4294967295, %s1619_s26   ;;  %p58_p0 = scmp.ne.s32.totalorder %s1603_s22, %s1599_s21  ;;  %s1619_s26 = sphi %s1676_s26, %s24_s26   ;;  %s1615_s25 = sphi %s1674_s25, %s2012_s25   ;;  %s1611_s24 = sphi %s1672_s24, %s2011_s24   ;;  %s1607_s23 = sphi %s1670_s23, %s2010_s23   ;;  %s1603_s22 = sphi %s1668_s22, %s2009_s22   ;;  %s1599_s21 = sphi %s1666_s21, %s2008_s21  }
   0xb   : > { %p1988_p1 = scmp.eq.s32.totalorder %s1695_s27, 0  ;;  %p1081_p2 = scmp.ge.s32.totalorder %s1619_s26, 1 }
   0xc   : > { %p205_p3 = scmp.lt.s32.totalorder %s1619_s26, 3  ;;  %s1621_s30 = smov [#allocation8]  }
   0xd   : > { %p1703_p4 = por %p1988_p1, %p58_p0  ;;  %s217_s7 = sshll.u32 %s1621_s30, 4  ;;  %s218_s7 = int_to_ptr.vmem [resolvable:$true] %s217_s7 }
   0xe   : > { %p1707_p5 = pnand %p1081_p2, %p205_p3  ;;  %s1622_s9 = smov [#allocation9]  }
   0xf   : > { %s1994_s28 = scalar_select %p1703_p4, 1, 0 }
  0x10   : > { %s1995_s29 = scalar_select %p1707_p5, 1, 0 }
  0x11   : > { %p1276_p6 = pneg %p1707_p5  ;;  %s230_s10 = sshll.u32 %s1622_s9, 4  ;;  %s1719_s10 = int_to_ptr.vmem [resolvable:$true] %s230_s10 }
  0x12   : > { %s1411_s13 = scalar_lea.hbm %s1983_s2, 1024 }
  0x13   : > { %p1715_p7 = pnand %p1276_p6, %p1988_p1  ;;  %p1412_p8 = scmp.ne.s32.totalorder %s1983_s2, %s1411_s13 }
  0x14   : > { %p1418_p12 = scmp.lt.u32.totalorder %s1411_s13, %s1983_s2 }
  0x15   : > { %p1413_p9 = pneg %p1715_p7 }
  0x17   : > { %p1414_p10 = pnand %p1413_p9, %p1412_p8 }
  0x19   : > { %p1415_p11 = pneg %p1414_p10 }
  0x1b   : > { %p1420_p13 = pnand %p1418_p12, %p1415_p11 }
  0x1d   : > { %1423 = shalt.err (!%p1420_p13)
}
  0x1e   : > { %s1424_s18 = scalar_lea.vmem %s218_s7, 1024  ;;  %p1432_p6 = scmp.lt.s32.totalorder %s218_s7, %s218_s7 }
  0x1f   : > { %p1425_p0 = scmp.ne.s32.totalorder %s218_s7, %s1424_s18  ;;  %p1433_p1 = scmp.lt.s32.totalorder %s1424_s18, %s1424_s18 }
  0x21   : > { %p1427_p2 = pnand %p1425_p0, %p1413_p9  ;;  %p1434_p4 = por %p1433_p1, %p1432_p6 }
  0x23   : > { %p1428_p3 = pneg %p1427_p2 }
  0x25   : > { %p1435_p5 = pnand %p1434_p4, %p1428_p3 }
  0x27   : > { %1438 = shalt.err (!%p1435_p5)
}
  0x28   : > { %s1991_s19 = smov 64   ;;  %s1992_s20 = smov 4  }
  0x29   : > { %1279 = dma.hbm_to_vmem [thread:$0]  (!%p1715_p7), %s1983_s2, 1024, %s218_s7, [#allocation7], %s1991_s19, %s1991_s19, %s1992_s20  }
  0x2a   : > { %s1439_s12 = scalar_lea.hbm %s1984_s3, 1024 }
  0x2b   : > { %p1440_p1 = scmp.ne.s32.totalorder %s1984_s3, %s1439_s12  ;;  %p1446_p8 = scmp.lt.u32.totalorder %s1439_s12, %s1984_s3 }
  0x2d   : > { %p1442_p4 = pnand %p1440_p1, %p1413_p9 }
  0x2f   : > { %p1443_p5 = pneg %p1442_p4 }
  0x31   : > { %p1448_p10 = pnand %p1446_p8, %p1443_p5 }
  0x33   : > { %1451 = shalt.err (!%p1448_p10)
}
  0x34   : > { %s1452_s7 = scalar_lea.vmem %s1719_s10, 1024  ;;  %p1460_p0 = scmp.lt.s32.totalorder %s1719_s10, %s1719_s10 }
  0x35   : > { %p1453_p11 = scmp.ne.s32.totalorder %s1719_s10, %s1452_s7  ;;  %p1461_p2 = scmp.lt.s32.totalorder %s1452_s7, %s1452_s7 }
  0x37   : > { %p1455_p12 = pnand %p1453_p11, %p1413_p9  ;;  %p1462_p3 = por %p1461_p2, %p1460_p0 }
  0x39   : > { %p1456_p13 = pneg %p1455_p12 }
  0x3b   : > { %p1463_p6 = pnand %p1462_p3, %p1456_p13 }
  0x3d   : > { %1466 = shalt.err (!%p1463_p6)
}
  0x3e   : > { %1282 = dma.hbm_to_vmem [thread:$0]  (!%p1715_p7), %s1984_s3, 1024, %s1719_s10, [#allocation10], %s1991_s19, %s1991_s19, %s1992_s20  }
  0x3f   : > { %s33_s21 = sadd.s32 1, %s1615_s25  ;;  %s45_s8 = sadd.s32 1, %s1607_s23 }
  0x40   : > { %p34_p9 = scmp.ge.s32.totalorder %s33_s21, 2  ;;  %p52_p1 = scmp.ne.s32.totalorder %s1607_s23, %s1603_s22 }
  0x41   : > { %p53_p4 = scmp.eq.s32.totalorder %s1619_s26, 0  ;;  %p1292_p5 = scmp.lt.s32.totalorder %s1619_s26, 2 }
  0x42   : > { %s2014_s21 = smov (%p34_p9, %s33_s21), 0  ;;  %s1783_s30 = sand.u32 1, %s1607_s23  }
  0x43   : > { %p54_p8 = por %p53_p4, %p52_p1  ;;  %s41_s9 = ssub.s32 %s1615_s25, %s2014_s21 }
  0x44   : > { %p43_p10 = scmp.eq.s32.totalorder %s41_s9, 0  ;;  %s1085_s10 = sshll.u32 %s1783_s30, 4 }
  0x45   : > { %s1156_s11 = sshll.u32 %s1615_s25, 8  ;;  %s1997_s0 = sld [smem:[#allocation17_spill]] }
  0x46   : > { %s1790_s12 = scalar_select %p43_p10, %s1607_s23, %s45_s8  }
  0x47   : > { %s254_s16 = scalar_lea.vmem [#allocation3], %s1085_s10  ;;  %p1801_p7 = pnand %p1292_p5, %p54_p8 }
  0x48   : > { %s264_s7 = sshll.u32 %s254_s16, 4  ;;  %s1088_s18 = sshll.u32 %s1783_s30, 8  ;;  %s1797_s7 = int_to_ptr.vmem [resolvable:$true] %s264_s7 }
  0x49   : > { %s1157_s8 = sshll.u32 %s1615_s25, 12  ;;  %s251_s9 = scalar_lea.sflag [#allocation4], %s1783_s30 }
  0x4a   : > { %p1469_p12 = pneg %p1801_p7 }
  0x4b   : > { %s1795_s15 = scalar_lea.hbm %s1997_s0, %s1156_s11  ;;  %s1472_s14 = scalar_lea.hbm %s1997_s0, 512 }
  0x4c   : > { %s1467_s11 = scalar_lea.hbm %s1795_s15, 256  ;;  %p1473_p2 = scmp.lt.u32.totalorder %s1795_s15, %s1997_s0 }
  0x4d   : > { %p1468_p11 = scmp.ne.s32.totalorder %s1795_s15, %s1467_s11  ;;  %p1474_p3 = scmp.lt.u32.totalorder %s1472_s14, %s1467_s11 }
  0x4e   : > { %p1476_p9 = scmp.lt.u32.totalorder %s1467_s11, %s1795_s15 }
  0x4f   : > { %p1470_p13 = pnand %p1469_p12, %p1468_p11  ;;  %p1475_p6 = por %p1474_p3, %p1473_p2 }
  0x51   : > { %p1471_p0 = pneg %p1470_p13  ;;  %p1477_p1 = por %p1476_p9, %p1475_p6 }
  0x53   : > { %p1478_p4 = pnand %p1477_p1, %p1471_p0 }
  0x55   : > { %1481 = shalt.err (!%p1478_p4)
}
  0x56   : > { %s1482_s20 = scalar_lea.vmem %s1797_s7, 256  ;;  %s1625_s10 = smov [#allocation3]  }
  0x57   : > { %p1483_p5 = scmp.ne.s32.totalorder %s1797_s7, %s1482_s20  ;;  %s1487_s13 = sshll.u32 %s1625_s10, 4  ;;  %s1488_s13 = int_to_ptr.vmem [resolvable:$false] %s1487_s13 }
  0x58   : > { %s1489_s19 = scalar_lea.vmem %s1488_s13, 512  ;;  %p1490_p11 = scmp.lt.s32.totalorder %s1797_s7, %s1488_s13 }
  0x59   : > { %p1485_p8 = pnand %p1483_p5, %p1469_p12  ;;  %p1491_p13 = scmp.lt.s32.totalorder %s1489_s19, %s1482_s20 }
  0x5b   : > { %p1486_p10 = pneg %p1485_p8  ;;  %p1492_p2 = por %p1491_p13, %p1490_p11 }
  0x5d   : > { %p1493_p3 = pnand %p1492_p2, %p1486_p10 }
  0x5f   : > { %1496 = shalt.err (!%p1493_p3)
}
  0x60   : > { %1286 = dma.hbm_to_vmem [thread:$0]  (!%p1801_p7), %s1795_s15, 256, %s1797_s7, %s251_s9  }
  0x61   : > { %s275_s11 = scalar_lea.vmem [#allocation6], %s1088_s18  ;;  %s271_s16 = sand.u32 1, %s1619_s26  }
  0x62   : > { %s282_s14 = sshll.u32 %s275_s11, 4  ;;  %s1843_s13 = scalar_lea.hbm %s1982_s1, %s1157_s8  ;;  %s1836_s14 = int_to_ptr.vmem [resolvable:$true] %s282_s14 }
  0x63   : > { %s1845_s19 = scalar_lea.sflag [#allocation7], %s271_s16  ;;  %s1497_s0 = scalar_lea.hbm %s1843_s13, 4096 }
  0x64   : > { %p1498_p0 = scmp.ne.s32.totalorder %s1843_s13, %s1497_s0  ;;  %s1502_s7 = scalar_lea.hbm %s1982_s1, 8192 }
  0x65   : > { %p1503_p1 = scmp.lt.u32.totalorder %s1843_s13, %s1982_s1  ;;  %p1504_p4 = scmp.lt.u32.totalorder %s1502_s7, %s1497_s0 }
  0x66   : > { %p1500_p6 = pnand %p1498_p0, %p1469_p12  ;;  %p1506_p8 = scmp.lt.u32.totalorder %s1497_s0, %s1843_s13 }
  0x67   : > { %p1505_p5 = por %p1504_p4, %p1503_p1 }
  0x68   : > { %p1501_p9 = pneg %p1500_p6 }
  0x69   : > { %p1507_p10 = por %p1506_p8, %p1505_p5 }
  0x6b   : > { %p1508_p11 = pnand %p1507_p10, %p1501_p9 }
  0x6d   : > { %1511 = shalt.err (!%p1508_p11)
}
  0x6e   : > { %s1512_s8 = scalar_lea.vmem %s1836_s14, 4096  ;;  %s1626_s11 = smov [#allocation6]  }
  0x6f   : > { %p1513_p13 = scmp.ne.s32.totalorder %s1836_s14, %s1512_s8  ;;  %s1517_s16 = sshll.u32 %s1626_s11, 4  ;;  %s1518_s16 = int_to_ptr.vmem [resolvable:$false] %s1517_s16 }
  0x70   : > { %s1519_s20 = scalar_lea.vmem %s1518_s16, 8192  ;;  %p1520_p0 = scmp.lt.s32.totalorder %s1836_s14, %s1518_s16 }
  0x71   : > { %p1515_p2 = pnand %p1513_p13, %p1469_p12  ;;  %p1521_p6 = scmp.lt.s32.totalorder %s1519_s20, %s1512_s8 }
  0x73   : > { %p1516_p3 = pneg %p1515_p2  ;;  %p1522_p1 = por %p1521_p6, %p1520_p0 }
  0x75   : > { %p1523_p4 = pnand %p1522_p1, %p1516_p3 }
  0x77   : > { %1526 = shalt.err (!%p1523_p4)
}
  0x78   : > { %s1999_s0 = smov 4   ;;  %s2000_s10 = smov 64  }
  0x79   : > { %1289 = dma.hbm_to_vmem [thread:$0]  (!%p1801_p7), %s1843_s13, 4096, %s1836_s14, %s1845_s19, %s2000_s10, %s2000_s10, %s1999_s0  }
  0x7a   : > { %p2001_p12 = scmp.ne.s32.totalorder %s1995_s29, 0 }
  0x7b   : > { %s296_s30 = sand.u32 (!%p2001_p12), 1, %s1603_s22   ;;  %p2002_p9 = scmp.ne.s32.totalorder (!%p2001_p12), %s1994_s28, 0 }
  0x7c   : > { %294 = sbr.rel (%p2001_p12) target bundleno = 1212 (0x4bc), region = 44  ;;  %s1092_s15 = sshll.u32 (!%p2001_p12), %s296_s30, 4 }
  0x7d   : > { %s297_s7 = scalar_lea.sflag (!%p2001_p12), [#allocation4], %s296_s30  ;;  %s1877_s18 = scalar_lea.vmem (!%p2001_p12), [#allocation3], %s1092_s15 }
  0x83   : > { %1578 = dma.done.wait (%p2002_p9), %s297_s7, 256  }
  0x84   : > { %1580 = vsyncadd (%p2002_p9), %s297_s7, 4294967040  ;;  %s305_s17 = sand.u32 1, %s1695_s27   ;;  %s1093_s9 = sshll.u32 %s296_s30, 8 }
  0x85   : > { %s306_s14 = scalar_lea.sflag [#allocation7], %s305_s17  ;;  %s1884_s13 = scalar_lea.vmem [#allocation6], %s1093_s9 }
  0x86   : > { %1582 = dma.done.wait (%p2002_p9), %s306_s14, 4096  }
  0x87   : > { %1584 = vsyncadd (%p2002_p9), %s306_s14, 4294963200  ;;  %p2003_p7 = scmp.eq.s32.totalorder %s1695_s27, 0 }
  0x89   : > { %1586 = dma.done.wait (%p2003_p7), [#allocation7], 1024   ;;  %p2004_p5 = pmov %p2003_p7 }
  0x8b   : > { %1588 = vsyncadd (%p2004_p5), [#allocation7], 4294966272  ;;  %p2005_p8 = pmov %p2004_p5 }
  0x8c   : > { %p2006_p10 = pmov %p2004_p5 }
  0x8d   : > { %1590 = dma.done.wait (%p2005_p8), [#allocation10], 1024  }
  0x8e   : > { %1592 = vsyncadd (%p2006_p10), [#allocation10], 4294966272  ;;  %p1096_p11 = scmp.ne.s32.totalorder %s1611_s24, 0 }
  0x8f   : > { %v1627_v0 = vmov (!%p1096_p11), 0.0  }
  0x90   : > { %352 = sbr.rel (%p1096_p11) target bundleno = 151 (0x97), region = 64  ;;  %353 = vst [vmem:[#allocation2] sm:$0xff] (!%p1096_p11), %v1627_v0 }
  0x97 PF: > { %v1353_v1 = vld [vmem:[%s1884_s13 + $0x40] sm:$0xff]   ;;  %v1357_v5 = vld [vmem:[%s1884_s13 + $0x48] sm:$0xff]   ;;  %v1361_v9 = vld [vmem:[%s1884_s13 + $0x50] sm:$0xff]   ;;  %p1133_p13 = scmp.ne.s32.totalorder %s1611_s24, 1 }
  0x98   : > { %v1354_v2 = vld [vmem:[%s1884_s13 + $0xc0] sm:$0xff]   ;;  %1158 = vmatprep.subr.bf16.mxu0 %v1353_v1  ;;  %v1358_v6 = vld [vmem:[%s1884_s13 + $0xc8] sm:$0xff]   ;;  %v1362_v10 = vld [vmem:[%s1884_s13 + $0xd0] sm:$0xff]   ;;  %v1628_v53 = vmov (!%p1133_p13), 0.0   ;;  %vm1629_vm0 = vmmov (!%p1133_p13), 0  }
  0x99   : > { %v1355_v3 = vld [vmem:[%s1884_s13] sm:$0xff]   ;;  %1180 = vmatprep.subr.bf16.mxu1 %v1354_v2  ;;  %v1359_v7 = vld [vmem:[%s1884_s13 + $0x8] sm:$0xff]   ;;  %v1363_v11 = vld [vmem:[%s1884_s13 + $0x10] sm:$0xff]  }
  0x9a   : > { %v1356_v4 = vld [vmem:[%s1884_s13 + $0x80] sm:$0xff]   ;;  %1159 = vmatpush3.bf16.msra.mxu0 %v1355_v3  ;;  %v1360_v8 = vld [vmem:[%s1884_s13 + $0x88] sm:$0xff]   ;;  %v1364_v12 = vld [vmem:[%s1884_s13 + $0x90] sm:$0xff]  }
  0x9b   : > { %1181 = vmatpush3.bf16.msra.mxu1 %v1356_v4  ;;  %1160 = vmatprep.subr.bf16.mxu0 %v1357_v5  ;;  %v1365_v13 = vld [vmem:[%s1884_s13 + $0x58] sm:$0xff]   ;;  %v1369_v17 = vld [vmem:[%s1884_s13 + $0x60] sm:$0xff]   ;;  %v1373_v21 = vld [vmem:[%s1884_s13 + $0x68] sm:$0xff]  }
  0x9c   : > { %1182 = vmatprep.subr.bf16.mxu1 %v1358_v6  ;;  %v1366_v14 = vld [vmem:[%s1884_s13 + $0xd8] sm:$0xff]   ;;  %v1370_v18 = vld [vmem:[%s1884_s13 + $0xe0] sm:$0xff]   ;;  %v1374_v22 = vld [vmem:[%s1884_s13 + $0xe8] sm:$0xff]  }
  0x9d   : > { %v1367_v15 = vld [vmem:[%s1884_s13 + $0x18] sm:$0xff]   ;;  %v1371_v19 = vld [vmem:[%s1884_s13 + $0x20] sm:$0xff]   ;;  %v1375_v23 = vld [vmem:[%s1884_s13 + $0x28] sm:$0xff]  }
  0x9e   : > { %1161 = vmatpush3.bf16.msra.mxu0 %v1359_v7  ;;  %v1368_v16 = vld [vmem:[%s1884_s13 + $0x98] sm:$0xff]   ;;  %v1372_v20 = vld [vmem:[%s1884_s13 + $0xa0] sm:$0xff]   ;;  %v1376_v24 = vld [vmem:[%s1884_s13 + $0xa8] sm:$0xff]  }
  0x9f   : > { %1183 = vmatpush3.bf16.msra.mxu1 %v1360_v8  ;;  %1162 = vmatprep.subr.bf16.mxu0 %v1361_v9  ;;  %v1377_v25 = vld [vmem:[%s1884_s13 + $0x70] sm:$0xff]   ;;  %v1381_v29 = vld [vmem:[%s1884_s13 + $0x78] sm:$0xff]   ;;  %v1389_v52 = vld [vmem:[#allocation8] sm:$0xff] (!%p1133_p13)  }
  0xa0   : > { %1184 = vmatprep.subr.bf16.mxu1 %v1362_v10  ;;  %v1378_v26 = vld [vmem:[%s1884_s13 + $0xf0] sm:$0xff]   ;;  %v1382_v30 = vld [vmem:[%s1884_s13 + $0xf8] sm:$0xff]   ;;  %v1390_v54 = vld [vmem:[#allocation8 + $0x8] sm:$0xff] (!%p1133_p13)  }
  0xa1   : > { %v1379_v27 = vld [vmem:[%s1884_s13 + $0x30] sm:$0xff]   ;;  %v1383_v31 = vld [vmem:[%s1884_s13 + $0x38] sm:$0xff]   ;;  %v1397_v56 = vld [vmem:[#allocation9] sm:$0xff] (!%p1133_p13)  }
  0xa2   : > { %1163 = vmatpush3.bf16.msra.mxu0 %v1363_v11  ;;  %v1380_v28 = vld [vmem:[%s1884_s13 + $0xb0] sm:$0xff]   ;;  %v1384_v32 = vld [vmem:[%s1884_s13 + $0xb8] sm:$0xff]   ;;  %v1398_v58 = vld [vmem:[#allocation9 + $0x8] sm:$0xff] (!%p1133_p13)  }
  0xa3   : > { %1185 = vmatpush3.bf16.msra.mxu1 %v1364_v12  ;;  %1164 = vmatprep.subr.bf16.mxu0 %v1365_v13  ;;  %v355_v33 = vld [vmem:[%s1877_s18] sm:$0xff]  ;;  %v356_v34 = vld [vmem:[%s1877_s18 + $0x8] sm:$0xff] }
  0xa4   : > { %1186 = vmatprep.subr.bf16.mxu1 %v1366_v14  ;;  %v1097_v35 = vcombine.low %v355_v33, %v355_v33  ;;  %v1098_v36 = vcombine.high %v355_v33, %v355_v33  ;;  %v1099_v37 = vcombine.low %v356_v34, %v356_v34  ;;  %v1100_v38 = vcombine.high %v356_v34, %v356_v34  ;;  %v354_v47 = vld [vmem:[#allocation2] sm:$0xff]  ;;  %v1391_v55 = vld [vmem:[#allocation8 + $0x10] sm:$0xff] (!%p1133_p13)   ;;  %v1393_v59 = vld [vmem:[#allocation8 + $0x20] sm:$0xff] (!%p1133_p13)  }
  0xa5   : > { %v1392_v57 = vld [vmem:[#allocation8 + $0x18] sm:$0xff] (!%p1133_p13)   ;;  %v1399_v60 = vld [vmem:[#allocation9 + $0x10] sm:$0xff] (!%p1133_p13)   ;;  %v1394_v61 = vld [vmem:[#allocation8 + $0x28] sm:$0xff] (!%p1133_p13)  }
  0xa6   : > { %1165 = vmatpush3.bf16.msra.mxu0 %v1367_v15  ;;  %659 = vmatprep.mubr.bf16.mxu0 %v1098_v36  ;;  %v1395_v62 = vld [vmem:[#allocation8 + $0x30] sm:$0xff] (!%p1133_p13)   ;;  %v1396_v63 = vld [vmem:[#allocation8 + $0x38] sm:$0xff] (!%p1133_p13)   ;;  %v1401_v3 = vld [vmem:[#allocation9 + $0x20] sm:$0xff] (!%p1133_p13)  }
  0xa7   : > { %1187 = vmatpush3.bf16.msra.mxu1 %v1368_v16  ;;  %1166 = vmatprep.subr.bf16.mxu0 %v1369_v17  ;;  %v1400_v2 = vld [vmem:[#allocation9 + $0x18] sm:$0xff] (!%p1133_p13)   ;;  %v1402_v4 = vld [vmem:[#allocation9 + $0x28] sm:$0xff] (!%p1133_p13)   ;;  %v1403_v5 = vld [vmem:[#allocation9 + $0x30] sm:$0xff] (!%p1133_p13)  }
  0xa8   : > { %1188 = vmatprep.subr.bf16.mxu1 %v1370_v18  ;;  %699 = vmatprep.mubr.bf16.mxu1 %v1100_v38  ;;  %v1404_v6 = vld [vmem:[#allocation9 + $0x38] sm:$0xff] (!%p1133_p13)  }
  0xa9   : > { %v1151_v34 = vld [vmem:[%s1986_s5] ss:$0 sm:$0xff] (!%p1133_p13) }
  0xaa   : > { %1167 = vmatpush3.bf16.msra.mxu0 %v1371_v19 }
  0xab   : > { %1189 = vmatpush3.bf16.msra.mxu1 %v1372_v20  ;;  %1168 = vmatprep.subr.bf16.mxu0 %v1373_v21 }
  0xac   : > { %1190 = vmatprep.subr.bf16.mxu1 %v1374_v22 }
  0xae   : > { %1169 = vmatpush3.bf16.msra.mxu0 %v1375_v23 }
  0xaf   : > { %1191 = vmatpush3.bf16.msra.mxu1 %v1376_v24  ;;  %1170 = vmatprep.subr.bf16.mxu0 %v1377_v25 }
  0xb0   : > { %1192 = vmatprep.subr.bf16.mxu1 %v1378_v26 }
  0xb2   : > { %1171 = vmatpush3.bf16.msra.mxu0 %v1379_v27 }
  0xb3   : > { %1193 = vmatpush3.bf16.msra.mxu1 %v1380_v28  ;;  %1172 = vmatprep.subr.bf16.mxu0 %v1381_v29 }
  0xb4   : > { %1194 = vmatprep.subr.bf16.mxu1 %v1382_v30 }
  0xb6   : > { %1173 = vmatpush3.bf16.msra.mxu0 %v1383_v31 }
  0xb7   : > { %1195 = vmatpush3.bf16.msra.mxu1 %v1384_v32  ;;  %1220 = vmatprep.subr.bf16.mxu0 (!%p1133_p13), %v1628_v53  ;;  %v1150_v32 = vld [vmem:[%s1985_s4] ss:$0 sm:$0xff] (!%p1133_p13) }
  0xb8   : > { %1240 = vmatprep.subr.bf16.mxu1 (!%p1133_p13), %v1628_v53 }
  0xb9   : > { %660 = vmatmul.mubr.bf16.vlgmr.msra.gmra.mrb[0].mxu0 %v1097_v35 }
  0xba   : > { %700 = vmatmul.mubr.bf16.vlgmr.msra.gmra.mrb[0].mxu1 %v1099_v37  ;;  %1221 = vmatpush3.bf16.msra.mxu0 (!%p1133_p13), %v1389_v52 }
  0xbb   : > { %1236 = vmatprep.mubr.msk.bf16.mxu0 (!%p1133_p13), %vm1629_vm0, %v1628_v53  ;;  %1222 = vmatprep.subr.bf16.mxu0 (!%p1133_p13), %v1628_v53 }
  0xbc   : > { %1256 = vmatprep.mubr.msk.bf16.mxu1 (!%p1133_p13), %vm1629_vm0, %v1628_v53  ;;  %1241 = vmatpush3.bf16.msra.mxu1 (!%p1133_p13), %v1397_v56 }
  0xbd   : > { %1242 = vmatprep.subr.bf16.mxu1 (!%p1133_p13), %v1628_v53 }
  0xbe   : > { %1223 = vmatpush3.bf16.msra.mxu0 (!%p1133_p13), %v1390_v54 }
  0xbf   : > { %1224 = vmatprep.subr.bf16.mxu0 (!%p1133_p13), %v1628_v53 }
  0xc0   : > { %1243 = vmatpush3.bf16.msra.mxu1 (!%p1133_p13), %v1398_v58 }
  0xc1   : > { %1244 = vmatprep.subr.bf16.mxu1 (!%p1133_p13), %v1628_v53 }
  0xc2   : > { %1225 = vmatpush3.bf16.msra.mxu0 (!%p1133_p13), %v1391_v55 }
  0xc3   : > { %1226 = vmatprep.subr.bf16.mxu0 (!%p1133_p13), %v1628_v53 }
  0xc4   : > { %1245 = vmatpush3.bf16.msra.mxu1 (!%p1133_p13), %v1399_v60 }
  0xc5   : > { %1246 = vmatprep.subr.bf16.mxu1 (!%p1133_p13), %v1628_v53 }
  0xc6   : > { %1227 = vmatpush3.bf16.msra.mxu0 (!%p1133_p13), %v1392_v57 }
  0xc7   : > { %1228 = vmatprep.subr.bf16.mxu0 (!%p1133_p13), %v1628_v53 }
  0xc8   : > { %1247 = vmatpush3.bf16.msra.mxu1 (!%p1133_p13), %v1400_v2 }
  0xc9   : > { %1248 = vmatprep.subr.bf16.mxu1 (!%p1133_p13), %v1628_v53 }
  0xca   : > { %1229 = vmatpush3.bf16.msra.mxu0 (!%p1133_p13), %v1393_v59 }
  0xcb   : > { %1230 = vmatprep.subr.bf16.mxu0 (!%p1133_p13), %v1628_v53 }
  0xcc   : > { %1249 = vmatpush3.bf16.msra.mxu1 (!%p1133_p13), %v1401_v3 }
  0xcd   : > { %1250 = vmatprep.subr.bf16.mxu1 (!%p1133_p13), %v1628_v53 }
  0xce   : > { %1231 = vmatpush3.bf16.msra.mxu0 (!%p1133_p13), %v1394_v61 }
  0xcf   : > { %1232 = vmatprep.subr.bf16.mxu0 (!%p1133_p13), %v1628_v53 }
  0xd0   : > { %1251 = vmatpush3.bf16.msra.mxu1 (!%p1133_p13), %v1402_v4 }
  0xd1   : > { %1252 = vmatprep.subr.bf16.mxu1 (!%p1133_p13), %v1628_v53 }
  0xd2   : > { %1233 = vmatpush3.bf16.msra.mxu0 (!%p1133_p13), %v1395_v62 }
  0xd3   : > { %1234 = vmatprep.subr.bf16.mxu0 (!%p1133_p13), %v1628_v53 }
  0xd4   : > { %1253 = vmatpush3.bf16.msra.mxu1 (!%p1133_p13), %v1403_v5 }
  0xd5   : > { %1254 = vmatprep.subr.bf16.mxu1 (!%p1133_p13), %v1628_v53 }
  0xd6   : > { %1235 = vmatpush3.bf16.msra.mxu0 (!%p1133_p13), %v1396_v63 }
  0xd8   : > { %1255 = vmatpush3.bf16.msra.mxu1 (!%p1133_p13), %v1404_v6 }
 0x18c   : > { %v1174_v39 = vpop.f32.mrb[0].mxu0 }
 0x18d   : > { %v1196_v40 = vpop.f32.mrb[0].mxu1  ;;  %v1175_v41 = vpop.f32.mrb[1].mxu0 }
 0x18e   : > { %v1197_v42 = vpop.f32.mrb[1].mxu1  ;;  %v1176_v43 = vadd.f32 %v1175_v41, %v1174_v39  ;;  %v1177_v45 = vpop.f32.mrb[2].mxu0 }
 0x18f   : > { %v1198_v44 = vadd.f32 %v1197_v42, %v1196_v40  ;;  %v1199_v46 = vpop.f32.mrb[2].mxu1  ;;  %v1178_v48 = vpop.f32.mrb[3].mxu0  ;;  %712 = sbr.rel (%p1133_p13) target bundleno = 1187 (0x4a3), region = 68 }
 0x190   : > { %v1200_v49 = vpop.f32.mrb[3].mxu1 }
 0x191   : > { %v702_v50 = vadd.f32 %v1198_v44, %v1176_v43 }
 0x193   : > { %v707_v51 = vadd.f32 %v702_v50, %v354_v47 }
 0x195   : > { %708 = vst [vmem:[#allocation2] sm:$0xff] %v707_v51 }
 0x19c   : > { %v713_v0 = vld [vmem:[#allocation2] sm:$0xff] }
 0x19d   : > { %v714_v1 = vpack.c.bf16 %v713_v0, %v713_v0 }
 0x19f   : > { %1237 = vmatmul.mubr.bf16.vlgmr.msra.gmra.mrb[0].mxu0 %v714_v1 }
 0x272   : > { %v813_v7 = vpop.f32.mrb[0].mxu0 }
 0x273   : > { %v820_v8 = vmul.f32 0.70710677, %v813_v7  ;;  %v1238_v9 = vpop.f32.mrb[1].mxu0  ;;  %v819_v13 = vmul.f32 0.5, %v813_v7 }
 0x274   : > { %v816_v10 = vpop.f32.mrb[2].mxu0 }
 0x275   : > { %1405 = verf.f32 %v820_v8  ;;  %v1239_v11 = vpop.f32.mrb[3].mxu0 }
 0x27f   : > { %v1406_v12 = vpop.eup %1405 }
 0x280   : > { %v822_v14 = vadd.f32 1.0, %v1406_v12 }
 0x282   : > { %v823_v15 = vmul.f32 %v822_v14, %v819_v13 }
 0x284   : > { %v824_v16 = vpack.c.bf16 %v823_v15, %v823_v15 }
 0x286   : > { %1257 = vmatmul.mubr.bf16.vlgmr.msra.gmra.mrb[0].mxu1 %v824_v16 }
 0x359   : > { %v923_v17 = vpop.f32.mrb[0].mxu1 }
 0x35a   : > { %v929_v18 = vadd.f32 %v923_v17, %v813_v7  ;;  %v1258_v19 = vpop.f32.mrb[1].mxu1 }
 0x35b   : > { %v926_v20 = vpop.f32.mrb[2].mxu1 }
 0x35c   : > { %930 = vadd.xlane.f32.xlu0 %v929_v18  ;;  %v1259_v21 = vpop.f32.mrb[3].mxu1  ;;  %v933_v22 = vmul.f32 %v929_v18, %v929_v18 }
 0x360   : > { %934 = vadd.xlane.f32.xlu0 %v933_v22 }
 0x3e9   : > { %v931_v23 = vpop.xlane.xlu0 %930 }
 0x3ea   : > { %v932_v24 = vmul.f32 0.03125, %v931_v23 }
 0x3ec   : > { %v937_v26 = vmul.f32 %v932_v24, %v932_v24  ;;  %v939_v30 = vsub.f32 %v929_v18, %v932_v24 }
 0x3ed   : > { %v935_v25 = vpop.xlane.xlu0 %934 }
 0x3ee   : > { %v936_v27 = vmul.f32 0.03125, %v935_v25 }
 0x3f0   : > { %v938_v28 = vsub.f32 %v936_v27, %v937_v26 }
 0x3f2   : > { %v940_v29 = vadd.f32 1e-05, %v938_v28 }
 0x3f4   : > { %1407 = vrsqrt.f32 %v940_v29 }
 0x3fe   : > { %v1408_v31 = vpop.eup %1407 }
 0x3ff   : > { %v942_v33 = vmul.f32 %v1408_v31, %v939_v30 }
 0x401   : > { %v950_v35 = vmul.f32 %v1150_v32, %v942_v33 }
 0x403   : > { %v958_v36 = vadd.f32 %v1151_v34, %v950_v35 }
 0x405   : > { %v959_v37 = vmul.f32 %v958_v36, %v958_v36 }
 0x407   : > { %960 = vadd.xlane.f32.xlu1 %v959_v37 }
 0x494   : > { %v961_v38 = vpop.xlane.xlu1 %960 }
 0x495   : > { %1409 = vrsqrt.f32 %v961_v38 }
 0x49f   : > { %v1410_v39 = vpop.eup %1409 }
 0x4a0   : > { %v963_v40 = vmul.f32 %v1410_v39, %v958_v36 }
 0x4a2   : > { %964 = vst [vmem:[#allocation11] sm:$0xff] %v963_v40 }
 0x4a3 PF: > { %p1295_p2 = scmp.eq.s32.totalorder %s1695_s27, 1  ;;  %s1630_s8 = smov [#allocation11]  }
 0x4a4   : > { %s974_s11 = sshll.u32 %s1630_s8, 4  ;;  %s975_s11 = int_to_ptr.vmem [resolvable:$true] %s974_s11 }
 0x4a5   : > { %s1527_s16 = scalar_lea.vmem %s975_s11, 128  ;;  %p1534_p1 = scmp.lt.s32.totalorder %s975_s11, %s975_s11 }
 0x4a6   : > { %p1528_p3 = scmp.ne.s32.totalorder %s975_s11, %s1527_s16  ;;  %p1535_p4 = scmp.lt.s32.totalorder %s1527_s16, %s1527_s16 }
 0x4a8   : > { %p1529_p0 = pnand %p1528_p3, %p1295_p2  ;;  %p1536_p12 = por %p1535_p4, %p1534_p1 }
 0x4aa   : > { %p1530_p6 = pneg %p1529_p0 }
 0x4ac   : > { %p1537_p9 = pnand %p1536_p12, %p1530_p6 }
 0x4ae   : > { %1540 = shalt.err (!%p1537_p9)
}
 0x4af   : > { %s1541_s10 = scalar_lea.hbm %s1987_s6, 128 }
 0x4b0   : > { %p1542_p7 = scmp.ne.s32.totalorder %s1987_s6, %s1541_s10  ;;  %p1547_p10 = scmp.lt.u32.totalorder %s1541_s10, %s1987_s6 }
 0x4b2   : > { %p1543_p5 = pnand %p1542_p7, %p1295_p2 }
 0x4b4   : > { %p1544_p8 = pneg %p1543_p5 }
 0x4b6   : > { %p1549_p11 = pnand %p1547_p10, %p1544_p8 }
 0x4b8   : > { %1552 = shalt.err (!%p1549_p11)
}
 0x4b9   : > { %1273 = dma.vmem_to_hbm [thread:$0]  (%p1295_p2), %s975_s11, 128, %s1987_s6, [#allocation5]  }
 0x4ba   : > { %1594 = dma.done.wait (%p1295_p2), [#allocation5], 128  }
 0x4bb   : > { %1596 = vsyncadd (%p1295_p2), [#allocation5], 4294967168 }
 0x4bc PF: > { %s24_s26 = sadd.s32 1, %s1619_s26   ;;  %s2007_s14 = smov %s2014_s21 }
 0x4bd   : > { %p21_p13 = scmp.ge.s32.totalorder %s24_s26, 4   ;;  %s2008_s21 = smov %s1603_s22 }
 0x4be   : > { %s2009_s22 = smov %s1607_s23  ;;  %s2010_s23 = smov %s1790_s12 }
 0x4bf   : > { %s2011_s24 = smov %s1615_s25  ;;  %s2012_s25 = smov %s2007_s14 }
 0x4c0   :  { %23 = sbr.rel (!%p21_p13) target bundleno = 10 (0xa), region = 111 }
 0x4c7   :  { %987 = vsyncpa [#allocation4], 1 }
 0x4c8   :  { %989 = vsyncpa [#allocation4 + $0x1], 1 }
 0x4c9   :  { %990 = vsyncpa [#allocation7], 1 }
 0x4ca   :  { %992 = vsyncpa [#allocation7 + $0x1], 1 }
 0x4cb   :  { %993 = vsyncpa [#allocation10], 1 }
 0x4cc   :  { %994 = vsyncpa [#allocation5], 1 }
 0x4cd   :  { %996 = vsyncpa [#allocation5 + $0x1], 1 }

</bundles_post_ra>
